<compile_context>
chip_gen: v7x
topology: tpu7x:2x2x1
jax: 0.10.0
libtpu: 0.0.40
codegen_flags: <defaults>
</compile_context>

<pallas_src>
import functools

import jax
import jax.numpy as jnp
from jax.experimental import pallas as pl
from jax.experimental.pallas import tpu as pltpu

ALPHA = 1.0   # Student-t dof (PyTorch module default)
BIG = 1e30    # sentinel ||c||^2 for padded cluster columns -> q ~ 0 there


def _round_up(v, m):
    return ((v + m - 1) // m) * m


def _fidec_kernel(x_ref, w1_ref, b1_ref, w2_ref, b2_ref,
                  w3ct_ref, b3_ref, w4_ref, b4_ref, c2_ref,
                  out_ref, *, D, B, K, Hp, out_pad):
    f32, bf16 = jnp.float32, jnp.bfloat16
    x = x_ref[...].astype(bf16)                                   # (T, Dp)

    # ---- encoder: Linear -> ReLU -> Linear (bf16 MXU, fp32 accumulate) ----
    h1 = jnp.maximum(
        jnp.dot(x, w1_ref[...], preferred_element_type=f32) + b1_ref[...],
        0.0)                                                      # (T, Hp)
    enc = (jnp.dot(h1.astype(bf16), w2_ref[...],
                   preferred_element_type=f32) + b2_ref[...])     # (T, Bp)
    enc_bf = enc.astype(bf16)

    # ---- decoder layer-1 fused with centers^T: one wide MXU RHS ----
    hc = jnp.dot(enc_bf, w3ct_ref[...],
                 preferred_element_type=f32)                      # (T, Hp+Kp)
    h2 = jnp.maximum(hc[:, :Hp] + b3_ref[...], 0.0)               # (T, Hp)
    cross = hc[:, Hp:]                                            # (T, Kp)
    recon = (jnp.dot(h2.astype(bf16), w4_ref[...],
                     preferred_element_type=f32) + b4_ref[...])   # (T, Dp)

    # ---- IDEC soft assignment (Student-t kernel) ----
    # ||e_i - c_j||^2 = ||e_i||^2 - 2 e_i.c_j + ||c_j||^2
    # enc2 / c2 use the same bf16-rounded operands as the cross term.
    enc_f = enc_bf.astype(f32)
    enc2 = jnp.sum(enc_f * enc_f, axis=1, keepdims=True)          # (T, 1)
    d2 = jnp.maximum(enc2 - 2.0 * cross + c2_ref[...], 0.0)       # (T, Kp)

    q = 1.0 / (1.0 + d2 * (1.0 / ALPHA))
    exponent = (ALPHA + 1.0) / 2.0
    if exponent != 1.0:                 # trace-time constant (ALPHA is Python)
        q = jnp.power(q, exponent)
    # Exact normalization so rows sum to 1 to fp32 precision.  Padded cluster
    # columns carry q ~ 1e-30 (BIG sentinel), so they do not bias the sum.
    q = q / jnp.sum(q, axis=1, keepdims=True)

    # ---- pack [recon | enc | q] into one lane-dense output slab ----
    pieces = [recon[:, :D], enc[:, :B], q[:, :K]]
    if out_pad:
        pieces.append(jnp.zeros((x.shape[0], out_pad), f32))
    out_ref[...] = jnp.concatenate(pieces, axis=1)


def functional_idec_forward(x, params, *, tile_n=1024):
    """Returns (reconstruction, q, encoded) exactly like FunctionalIDEC.forward."""
    w1, b1, w2, b2, w3, b3, w4, b4, centers = params
    N, D = x.shape
    H = w1.shape[1]
    B = w2.shape[1]
    K = centers.shape[0]

    f32, bf16 = jnp.float32, jnp.bfloat16

    # Lane-dense padding of feature dims (multiples of 128).
    Dp, Hp, Bp, Kp = (_round_up(d, 128) for d in (D, H, B, K))
    OUT = D + B + K
    OUTp = _round_up(OUT, 128)
    out_pad = OUTp - OUT

    # Row tiling: multiple of 16 (bf16 sublane packing), minimal row padding.
    tn = max(16, min(_round_up(tile_n, 16), _round_up(N, 16)))
    Np = _round_up(N, tn)
    grid = (Np // tn,)

    def pad2(a, rows, cols, dtype):
        a = a.astype(dtype)
        return jnp.pad(a, ((0, rows - a.shape[0]), (0, cols - a.shape[1])))

    # x stays f32 (cast to bf16 inside the kernel -> no extra HBM cast pass).
    x_p = pad2(x, Np, Dp, f32)
    w1_p = pad2(w1, Dp, Hp, bf16); b1_p = pad2(b1, 1, Hp, f32)
    w2_p = pad2(w2, Hp, Bp, bf16); b2_p = pad2(b2, 1, Bp, f32)
    w3_p = pad2(w3, Bp, Hp, bf16); b3_p = pad2(b3, 1, Hp, f32)
    w4_p = pad2(w4, Hp, Dp, bf16); b4_p = pad2(b4, 1, Dp, f32)
    ct_p = pad2(centers.T, Bp, Kp, bf16)                  # (Bp, Kp)
    w3ct_p = jnp.concatenate([w3_p, ct_p], axis=1)        # (Bp, Hp + Kp)

    # Hoisted ||c_j||^2 from the same bf16-rounded centers as the cross term;
    # padded cluster columns get a huge distance (-> q ~ 0 there).
    c_bf = centers.astype(bf16).astype(f32)
    c2 = jnp.sum(c_bf * c_bf, axis=1)                     # (K,)
    c2_p = jnp.full((1, Kp), BIG, f32).at[0, :K].set(c2)

    kernel = functools.partial(_fidec_kernel, D=D, B=B, K=K, Hp=Hp,
                               out_pad=out_pad)

    def row_spec(cols):
        return pl.BlockSpec((tn, cols), lambda i: (i, 0))

    def const_spec(shape):
        return pl.BlockSpec(shape, lambda i: (0, 0))

    in_arrays = (x_p, w1_p, b1_p, w2_p, b2_p, w3ct_p, b3_p, w4_p, b4_p, c2_p)
    flops = 2 * Np * (Dp * Hp + Hp * Bp + Bp * (Hp + Kp) + Hp * Dp)
    bytes_accessed = (sum(int(a.size) * a.dtype.itemsize for a in in_arrays)
                      + 4 * Np * OUTp)

    packed = pl.pallas_call(
        kernel,
        out_shape=jax.ShapeDtypeStruct((Np, OUTp), f32),
        grid_spec=pltpu.PrefetchScalarGridSpec(
            num_scalar_prefetch=0,
            grid=grid,
            in_specs=[
                row_spec(Dp),                              # x tile streams
                const_spec((Dp, Hp)), const_spec((1, Hp)),
                const_spec((Hp, Bp)), const_spec((1, Bp)),
                const_spec((Bp, Hp + Kp)), const_spec((1, Hp)),
                const_spec((Hp, Dp)), const_spec((1, Dp)),
                const_spec((1, Kp)),
            ],
            out_specs=row_spec(OUTp),
        ),
        compiler_params=pltpu.CompilerParams(
            dimension_semantics=("parallel",),
            vmem_limit_bytes=64 * 1024 * 1024),
        cost_estimate=pl.CostEstimate(
            flops=flops, transcendentals=0, bytes_accessed=bytes_accessed),
    )(*in_arrays)

    # Slice the packed slab back to the logical outputs.
    recon = packed[:N, :D]
    enc = packed[:N, D:D + B]
    q = packed[:N, D + B:D + B + K]
    return recon, q, enc


def make_params(key, D, H, B, K):
    ks = jax.random.split(key, 9)
    s = 0.1
    w1 = s * jax.random.normal(ks[0], (D, H), jnp.float32)
    b1 = s * jax.random.normal(ks[1], (1, H), jnp.float32)
    w2 = s * jax.random.normal(ks[2], (H, B), jnp.float32)
    b2 = s * jax.random.normal(ks[3], (1, B), jnp.float32)
    w3 = s * jax.random.normal(ks[4], (B, H), jnp.float32)
    b3 = s * jax.random.normal(ks[5], (1, H), jnp.float32)
    w4 = s * jax.random.normal(ks[6], (H, D), jnp.float32)
    b4 = s * jax.random.normal(ks[7], (1, D), jnp.float32)
    centers = jax.random.normal(ks[8], (K, B), jnp.float32)  # IDEC cluster_centers
    return (w1, b1, w2, b2, w3, b3, w4, b4, centers)


def reference_forward(x, params):
    """Pure-JAX fp32 reference mirroring the PyTorch forward semantics."""
    w1, b1, w2, b2, w3, b3, w4, b4, c = params
    h1 = jnp.maximum(x @ w1 + b1, 0.0)
    enc = h1 @ w2 + b2
    h2 = jnp.maximum(enc @ w3 + b3, 0.0)
    recon = h2 @ w4 + b4
    d2 = jnp.sum((enc[:, None, :] - c[None, :, :]) ** 2, axis=2)
    q = 1.0 / (1.0 + d2 / ALPHA)
    q = q ** ((ALPHA + 1.0) / 2.0)
    q = q / jnp.sum(q, axis=1, keepdims=True)
    return recon, q, enc


# TODO(synk): target_distribution() is a training-time host-side helper, not
# part of forward(); left to plain JAX outside the kernel.

if __name__ == "__main__":
    # Small shapes: batch=8, input D=64, hidden H=32, bottleneck B=16, clusters K=4
    N, D, H, B, K = 8, 64, 32, 16, 4
    key = jax.random.PRNGKey(0)
    kx, kp = jax.random.split(key)
    x = jax.random.normal(kx, (N, D), jnp.float32)
    params = make_params(kp, D, H, B, K)

    recon, q, enc = functional_idec_forward(x, params)
    jax.block_until_ready((recon, q, enc))

    r_ref, q_ref, e_ref = reference_forward(x, params)
    assert recon.shape == (N, D) and q.shape == (N, K) and enc.shape == (N, B)
    # bf16 MXU operands with fp32 accumulation -> slightly relaxed tolerance.
    assert jnp.allclose(recon, r_ref, rtol=2e-2, atol=2e-2)
    assert jnp.allclose(enc, e_ref, rtol=2e-2, atol=2e-2)
    assert jnp.allclose(q, q_ref, rtol=2e-2, atol=2e-2)
    # Exact normalization inside the kernel -> rows sum to 1 to fp32 precision.
    assert jnp.allclose(jnp.sum(q, axis=1), jnp.ones((N,)), rtol=1e-4, atol=1e-4)

    print("KERNEL_OK")
</pallas_src>

<mosaic_0001>
module attributes {stable_mosaic.version = 11 : i64} {
  func.func @_fidec_kernel(%arg0: i32, %arg1: memref<16x128xf32, #tpu.memory_space<vmem>>, %arg2: memref<128x128xbf16, #tpu.memory_space<vmem>>, %arg3: memref<1x128xf32, #tpu.memory_space<vmem>>, %arg4: memref<128x128xbf16, #tpu.memory_space<vmem>>, %arg5: memref<1x128xf32, #tpu.memory_space<vmem>>, %arg6: memref<128x256xbf16, #tpu.memory_space<vmem>>, %arg7: memref<1x128xf32, #tpu.memory_space<vmem>>, %arg8: memref<128x128xbf16, #tpu.memory_space<vmem>>, %arg9: memref<1x128xf32, #tpu.memory_space<vmem>>, %arg10: memref<1x128xf32, #tpu.memory_space<vmem>>, %arg11: memref<16x128xf32, #tpu.memory_space<vmem>>) attributes {dimension_semantics = [#tpu.dimension_semantics<parallel>], iteration_bounds = array<i64: 1>, scalar_prefetch = 0 : i64, scratch_operands = 0 : i64, tpu.core_type = #tpu.core_type<tc>, window_params = [{transform_indices = @transform_0, window_bounds = array<i64: 16, 128>}, {pipeline_mode = #tpu.pipeline_mode<synchronous>, transform_indices = @transform_1, window_bounds = array<i64: 128, 128>}, {pipeline_mode = #tpu.pipeline_mode<synchronous>, transform_indices = @transform_2, window_bounds = array<i64: 1, 128>}, {pipeline_mode = #tpu.pipeline_mode<synchronous>, transform_indices = @transform_3, window_bounds = array<i64: 128, 128>}, {pipeline_mode = #tpu.pipeline_mode<synchronous>, transform_indices = @transform_4, window_bounds = array<i64: 1, 128>}, {pipeline_mode = #tpu.pipeline_mode<synchronous>, transform_indices = @transform_5, window_bounds = array<i64: 128, 256>}, {pipeline_mode = #tpu.pipeline_mode<synchronous>, transform_indices = @transform_6, window_bounds = array<i64: 1, 128>}, {pipeline_mode = #tpu.pipeline_mode<synchronous>, transform_indices = @transform_7, window_bounds = array<i64: 128, 128>}, {pipeline_mode = #tpu.pipeline_mode<synchronous>, transform_indices = @transform_8, window_bounds = array<i64: 1, 128>}, {pipeline_mode = #tpu.pipeline_mode<synchronous>, transform_indices = @transform_9, window_bounds = array<i64: 1, 128>}, {transform_indices = @transform_10, window_bounds = array<i64: 16, 128>}]} {
    %c0 = arith.constant 0 : index
    %c0_0 = arith.constant 0 : index
    %0 = vector.load %arg1[%c0, %c0_0] : memref<16x128xf32, #tpu.memory_space<vmem>>, vector<16x128xf32>
    %1 = arith.truncf %0 : vector<16x128xf32> to vector<16x128xbf16>
    %c0_1 = arith.constant 0 : index
    %c0_2 = arith.constant 0 : index
    %2 = vector.load %arg2[%c0_1, %c0_2] : memref<128x128xbf16, #tpu.memory_space<vmem>>, vector<128x128xbf16>
    %cst = arith.constant dense<0.000000e+00> : vector<16x128xf32>
    %3 = tpu.matmul %1, %2, %cst {dimension_numbers = #tpu.dot_dimension_numbers<[1], [0], [0], [1], [0, 0, 1, 1], [], []>} : vector<16x128xbf16>, vector<128x128xbf16>, vector<16x128xf32> -> vector<16x128xf32>
    %c0_3 = arith.constant 0 : index
    %c0_4 = arith.constant 0 : index
    %4 = vector.load %arg3[%c0_3, %c0_4] : memref<1x128xf32, #tpu.memory_space<vmem>>, vector<1x128xf32>
    %5 = vector.broadcast %4 : vector<1x128xf32> to vector<16x128xf32>
    %6 = arith.addf %3, %5 : vector<16x128xf32>
    %cst_5 = arith.constant 0.000000e+00 : f32
    %7 = vector.broadcast %cst_5 : f32 to vector<16x128xf32>
    %8 = arith.maximumf %6, %7 : vector<16x128xf32>
    %9 = arith.truncf %8 : vector<16x128xf32> to vector<16x128xbf16>
    %c0_6 = arith.constant 0 : index
    %c0_7 = arith.constant 0 : index
    %10 = vector.load %arg4[%c0_6, %c0_7] : memref<128x128xbf16, #tpu.memory_space<vmem>>, vector<128x128xbf16>
    %cst_8 = arith.constant dense<0.000000e+00> : vector<16x128xf32>
    %11 = tpu.matmul %9, %10, %cst_8 {dimension_numbers = #tpu.dot_dimension_numbers<[1], [0], [0], [1], [0, 0, 1, 1], [], []>} : vector<16x128xbf16>, vector<128x128xbf16>, vector<16x128xf32> -> vector<16x128xf32>
    %c0_9 = arith.constant 0 : index
    %c0_10 = arith.constant 0 : index
    %12 = vector.load %arg5[%c0_9, %c0_10] : memref<1x128xf32, #tpu.memory_space<vmem>>, vector<1x128xf32>
    %13 = vector.broadcast %12 : vector<1x128xf32> to vector<16x128xf32>
    %14 = arith.addf %11, %13 : vector<16x128xf32>
    %15 = arith.truncf %14 : vector<16x128xf32> to vector<16x128xbf16>
    %c0_11 = arith.constant 0 : index
    %c0_12 = arith.constant 0 : index
    %16 = vector.load %arg6[%c0_11, %c0_12] : memref<128x256xbf16, #tpu.memory_space<vmem>>, vector<128x256xbf16>
    %cst_13 = arith.constant dense<0.000000e+00> : vector<16x256xf32>
    %17 = tpu.matmul %15, %16, %cst_13 {dimension_numbers = #tpu.dot_dimension_numbers<[1], [0], [0], [1], [0, 0, 1, 1], [], []>} : vector<16x128xbf16>, vector<128x256xbf16>, vector<16x256xf32> -> vector<16x256xf32>
    %18 = vector.extract_strided_slice %17 {offsets = [0, 0], sizes = [16, 128], strides = [1, 1]} : vector<16x256xf32> to vector<16x128xf32>
    %c0_14 = arith.constant 0 : index
    %c0_15 = arith.constant 0 : index
    %19 = vector.load %arg7[%c0_14, %c0_15] : memref<1x128xf32, #tpu.memory_space<vmem>>, vector<1x128xf32>
    %20 = vector.broadcast %19 : vector<1x128xf32> to vector<16x128xf32>
    %21 = arith.addf %18, %20 : vector<16x128xf32>
    %cst_16 = arith.constant 0.000000e+00 : f32
    %22 = vector.broadcast %cst_16 : f32 to vector<16x128xf32>
    %23 = arith.maximumf %21, %22 : vector<16x128xf32>
    %24 = vector.extract_strided_slice %17 {offsets = [0, 128], sizes = [16, 128], strides = [1, 1]} : vector<16x256xf32> to vector<16x128xf32>
    %25 = arith.truncf %23 : vector<16x128xf32> to vector<16x128xbf16>
    %c0_17 = arith.constant 0 : index
    %c0_18 = arith.constant 0 : index
    %26 = vector.load %arg8[%c0_17, %c0_18] : memref<128x128xbf16, #tpu.memory_space<vmem>>, vector<128x128xbf16>
    %cst_19 = arith.constant dense<0.000000e+00> : vector<16x128xf32>
    %27 = tpu.matmul %25, %26, %cst_19 {dimension_numbers = #tpu.dot_dimension_numbers<[1], [0], [0], [1], [0, 0, 1, 1], [], []>} : vector<16x128xbf16>, vector<128x128xbf16>, vector<16x128xf32> -> vector<16x128xf32>
    %c0_20 = arith.constant 0 : index
    %c0_21 = arith.constant 0 : index
    %28 = vector.load %arg9[%c0_20, %c0_21] : memref<1x128xf32, #tpu.memory_space<vmem>>, vector<1x128xf32>
    %29 = vector.broadcast %28 : vector<1x128xf32> to vector<16x128xf32>
    %30 = arith.addf %27, %29 : vector<16x128xf32>
    %31 = arith.extf %15 : vector<16x128xbf16> to vector<16x128xf32>
    %32 = arith.mulf %31, %31 : vector<16x128xf32>
    %cst_22 = arith.constant dense<0.000000e+00> : vector<16xf32>
    %33 = vector.multi_reduction <add>, %32, %cst_22 [1] : vector<16x128xf32> to vector<16xf32>
    %34 = vector.shape_cast %33 : vector<16xf32> to vector<16x1xf32>
    %cst_23 = arith.constant 2.000000e+00 : f32
    %35 = vector.broadcast %cst_23 : f32 to vector<16x128xf32>
    %36 = arith.mulf %35, %24 : vector<16x128xf32>
    %37 = vector.broadcast %34 : vector<16x1xf32> to vector<16x128xf32>
    %38 = arith.subf %37, %36 : vector<16x128xf32>
    %c0_24 = arith.constant 0 : index
    %c0_25 = arith.constant 0 : index
    %39 = vector.load %arg10[%c0_24, %c0_25] : memref<1x128xf32, #tpu.memory_space<vmem>>, vector<1x128xf32>
    %40 = vector.broadcast %39 : vector<1x128xf32> to vector<16x128xf32>
    %41 = arith.addf %38, %40 : vector<16x128xf32>
    %cst_26 = arith.constant 0.000000e+00 : f32
    %42 = vector.broadcast %cst_26 : f32 to vector<16x128xf32>
    %43 = arith.maximumf %41, %42 : vector<16x128xf32>
    %cst_27 = arith.constant 1.000000e+00 : f32
    %44 = vector.broadcast %cst_27 : f32 to vector<16x128xf32>
    %45 = arith.mulf %43, %44 : vector<16x128xf32>
    %cst_28 = arith.constant 1.000000e+00 : f32
    %46 = vector.broadcast %cst_28 : f32 to vector<16x128xf32>
    %47 = arith.addf %46, %45 : vector<16x128xf32>
    %cst_29 = arith.constant 1.000000e+00 : f32
    %48 = vector.broadcast %cst_29 : f32 to vector<16x128xf32>
    %49 = arith.divf %48, %47 : vector<16x128xf32>
    %cst_30 = arith.constant dense<0.000000e+00> : vector<16xf32>
    %50 = vector.multi_reduction <add>, %49, %cst_30 [1] : vector<16x128xf32> to vector<16xf32>
    %51 = vector.shape_cast %50 : vector<16xf32> to vector<16x1xf32>
    %52 = vector.broadcast %51 : vector<16x1xf32> to vector<16x128xf32>
    %53 = arith.divf %49, %52 : vector<16x128xf32>
    %54 = vector.extract_strided_slice %30 {offsets = [0, 0], sizes = [16, 64], strides = [1, 1]} : vector<16x128xf32> to vector<16x64xf32>
    %55 = vector.extract_strided_slice %14 {offsets = [0, 0], sizes = [16, 16], strides = [1, 1]} : vector<16x128xf32> to vector<16x16xf32>
    %56 = vector.extract_strided_slice %53 {offsets = [0, 0], sizes = [16, 4], strides = [1, 1]} : vector<16x128xf32> to vector<16x4xf32>
    %cst_31 = arith.constant 0.000000e+00 : f32
    %57 = vector.broadcast %cst_31 : f32 to vector<16x44xf32>
    %58 = tpu.concatenate %54, %55, %56, %57 in 1 : vector<16x64xf32>, vector<16x16xf32>, vector<16x4xf32>, vector<16x44xf32> -> vector<16x128xf32>
    %c0_32 = arith.constant 0 : index
    %c0_33 = arith.constant 0 : index
    %59 = vector.load %arg11[%c0_32, %c0_33] : memref<16x128xf32, #tpu.memory_space<vmem>>, vector<16x128xf32>
    tpu.vector_store %arg11[%c0_32, %c0_33], %58 {strides = array<i32>} : memref<16x128xf32, #tpu.memory_space<vmem>>, vector<16x128xf32>,
    return
  }
  func.func @transform_0(%arg0: i32) -> (i32, i32) {
    %c0_i32 = arith.constant 0 : i32
    %c0_i32_0 = arith.constant 0 : i32
    return %arg0, %c0_i32 : i32, i32
  }
  func.func @transform_1(%arg0: i32) -> (i32, i32) {
    %c0_i32 = arith.constant 0 : i32
    %c0_i32_0 = arith.constant 0 : i32
    %c0_i32_1 = arith.constant 0 : i32
    return %c0_i32, %c0_i32_0 : i32, i32
  }
  func.func @transform_2(%arg0: i32) -> (i32, i32) {
    %c0_i32 = arith.constant 0 : i32
    %c0_i32_0 = arith.constant 0 : i32
    %c0_i32_1 = arith.constant 0 : i32
    return %c0_i32, %c0_i32_0 : i32, i32
  }
  func.func @transform_3(%arg0: i32) -> (i32, i32) {
    %c0_i32 = arith.constant 0 : i32
    %c0_i32_0 = arith.constant 0 : i32
    %c0_i32_1 = arith.constant 0 : i32
    return %c0_i32, %c0_i32_0 : i32, i32
  }
  func.func @transform_4(%arg0: i32) -> (i32, i32) {
    %c0_i32 = arith.constant 0 : i32
    %c0_i32_0 = arith.constant 0 : i32
    %c0_i32_1 = arith.constant 0 : i32
    return %c0_i32, %c0_i32_0 : i32, i32
  }
  func.func @transform_5(%arg0: i32) -> (i32, i32) {
    %c0_i32 = arith.constant 0 : i32
    %c0_i32_0 = arith.constant 0 : i32
    %c0_i32_1 = arith.constant 0 : i32
    return %c0_i32, %c0_i32_0 : i32, i32
  }
  func.func @transform_6(%arg0: i32) -> (i32, i32) {
    %c0_i32 = arith.constant 0 : i32
    %c0_i32_0 = arith.constant 0 : i32
    %c0_i32_1 = arith.constant 0 : i32
    return %c0_i32, %c0_i32_0 : i32, i32
  }
  func.func @transform_7(%arg0: i32) -> (i32, i32) {
    %c0_i32 = arith.constant 0 : i32
    %c0_i32_0 = arith.constant 0 : i32
    %c0_i32_1 = arith.constant 0 : i32
    return %c0_i32, %c0_i32_0 : i32, i32
  }
  func.func @transform_8(%arg0: i32) -> (i32, i32) {
    %c0_i32 = arith.constant 0 : i32
    %c0_i32_0 = arith.constant 0 : i32
    %c0_i32_1 = arith.constant 0 : i32
    return %c0_i32, %c0_i32_0 : i32, i32
  }
  func.func @transform_9(%arg0: i32) -> (i32, i32) {
    %c0_i32 = arith.constant 0 : i32
    %c0_i32_0 = arith.constant 0 : i32
    %c0_i32_1 = arith.constant 0 : i32
    return %c0_i32, %c0_i32_0 : i32, i32
  }
  func.func @transform_10(%arg0: i32) -> (i32, i32) {
    %c0_i32 = arith.constant 0 : i32
    %c0_i32_0 = arith.constant 0 : i32
    return %arg0, %c0_i32 : i32, i32
  }
}

</mosaic_0001>

<bundles_post_ra>
// kernel: tpu_custom_call.1
= control target key start
LH: loop header
LB: loop body
LE: loop exit
PB: predicated region body
PF: predicated region fallthrough
CT: control target
= control target key end

     0   :  { %15 = vsyncpa [#allocation3], 0  ;;  %s1473_s0 = inlined_call_operand.hbm [shape: f32[16,128], index: 0, kind: input, shape index: {}]   ;;  %s1474_s1 = inlined_call_operand.hbm [shape: bf16[128,128], index: 1, kind: input, shape index: {}]   ;;  %s1475_s2 = inlined_call_operand.hbm [shape: f32[1,128], index: 2, kind: input, shape index: {}]   ;;  %s1476_s3 = inlined_call_operand.hbm [shape: bf16[128,128], index: 3, kind: input, shape index: {}]   ;;  %s1477_s4 = inlined_call_operand.hbm [shape: f32[1,128], index: 4, kind: input, shape index: {}]   ;;  %s1478_s5 = inlined_call_operand.hbm [shape: bf16[128,256], index: 5, kind: input, shape index: {}]   ;;  %s1479_s6 = inlined_call_operand.hbm [shape: f32[1,128], index: 6, kind: input, shape index: {}]   ;;  %s1480_s7 = inlined_call_operand.hbm [shape: bf16[128,128], index: 7, kind: input, shape index: {}]   ;;  %s1481_s8 = inlined_call_operand.hbm [shape: f32[1,128], index: 8, kind: input, shape index: {}]   ;;  %s1482_s9 = inlined_call_operand.hbm [shape: f32[1,128], index: 9, kind: input, shape index: {}]   ;;  %s1483_s10 = inlined_call_operand.hbm [shape: f32[16,128], index: 10, kind: output, shape index: {}]  }
   0x1   :  { %16 = vsyncpa [#allocation6], 0 }
   0x2   :  { %17 = vsyncpa [#allocation9], 0 }
   0x3   :  { %18 = vsyncpa [#allocation12], 0 }
   0x4   :  { %19 = vsyncpa [#allocation15], 0 }
   0x5   :  { %20 = vsyncpa [#allocation18], 0 }
   0x6   :  { %21 = vsyncpa [#allocation4], 0  ;;  %s1206_s13 = smov [#allocation5]   ;;  %s950_s17 = scalar_lea.hbm %s1474_s1, 1024 }
   0x7   :  { %s39_s14 = sshll.u32 %s1206_s13, 4  ;;  %p951_p0 = scmp.ne.s32.totalorder %s1474_s1, %s950_s17  ;;  %s40_s14 = int_to_ptr.vmem [resolvable:$true] %s39_s14 }
   0x8   :  { %p954_p1 = scmp.lt.u32.totalorder %s950_s17, %s1474_s1 }
   0xa   :  { %p956_p2 = pnand %p954_p1, %p951_p0 }
   0xc   :  { %959 = shalt.err (!%p956_p2)
}
   0xd   :  { %s960_s22 = scalar_lea.vmem %s40_s14, 1024  ;;  %p965_p4 = scmp.lt.s32.totalorder %s40_s14, %s40_s14 }
   0xe   :  { %p961_p3 = scmp.ne.s32.totalorder %s40_s14, %s960_s22  ;;  %p966_p5 = scmp.lt.s32.totalorder %s960_s22, %s960_s22 }
  0x10   :  { %p967_p6 = por %p966_p5, %p965_p4 }
  0x12   :  { %p968_p7 = pnand %p967_p6, %p961_p3 }
  0x14   :  { %971 = shalt.err (!%p968_p7)
}
  0x15   :  { %s1207_s23 = smov 64   ;;  %s1208_s24 = smov 4  }
  0x16   :  { %45 = dma.hbm_to_vmem [thread:$0]  %s1474_s1, 1024, %s40_s14, [#allocation6], %s1207_s23, %s1207_s23, %s1208_s24  }
  0x17   :  { %s1209_s27 = smov [#allocation8]   ;;  %s972_s11 = scalar_lea.hbm %s1476_s3, 1024 }
  0x18   :  { %s61_s28 = sshll.u32 %s1209_s27, 4  ;;  %p973_p8 = scmp.ne.s32.totalorder %s1476_s3, %s972_s11  ;;  %s62_s28 = int_to_ptr.vmem [resolvable:$true] %s61_s28 }
  0x19   :  { %p976_p9 = scmp.lt.u32.totalorder %s972_s11, %s1476_s3 }
  0x1b   :  { %p978_p10 = pnand %p976_p9, %p973_p8 }
  0x1d   :  { %981 = shalt.err (!%p978_p10)
}
  0x1e   :  { %s982_s17 = scalar_lea.vmem %s62_s28, 1024  ;;  %p987_p12 = scmp.lt.s32.totalorder %s62_s28, %s62_s28 }
  0x1f   :  { %p983_p11 = scmp.ne.s32.totalorder %s62_s28, %s982_s17  ;;  %p988_p13 = scmp.lt.s32.totalorder %s982_s17, %s982_s17 }
  0x21   :  { %p989_p0 = por %p988_p13, %p987_p12 }
  0x23   :  { %p990_p1 = pnand %p989_p0, %p983_p11 }
  0x25   :  { %993 = shalt.err (!%p990_p1)
}
  0x26   :  { %67 = dma.hbm_to_vmem [thread:$0]  %s1476_s3, 1024, %s62_s28, [#allocation9], %s1207_s23, %s1207_s23, %s1208_s24  }
  0x27   :  { %s1210_s18 = smov [#allocation11]   ;;  %s1211_s20 = smov [#allocation14]  }
  0x28   :  { %s83_s19 = sshll.u32 %s1210_s18, 4  ;;  %s105_s21 = sshll.u32 %s1211_s20, 4  ;;  %s84_s19 = int_to_ptr.vmem [resolvable:$true] %s83_s19  ;;  %s1310_s21 = int_to_ptr.vmem [resolvable:$true] %s105_s21 }
  0x29   :  { %s994_s26 = scalar_lea.hbm %s1478_s5, 2048 }
  0x2a   :  { %p995_p2 = scmp.ne.s32.totalorder %s1478_s5, %s994_s26  ;;  %p998_p3 = scmp.lt.u32.totalorder %s994_s26, %s1478_s5 }
  0x2c   :  { %p1000_p4 = pnand %p998_p3, %p995_p2 }
  0x2e   :  { %1003 = shalt.err (!%p1000_p4)
}
  0x2f   :  { %s1004_s3 = scalar_lea.vmem %s84_s19, 2048  ;;  %p1009_p6 = scmp.lt.s32.totalorder %s84_s19, %s84_s19 }
  0x30   :  { %p1005_p5 = scmp.ne.s32.totalorder %s84_s19, %s1004_s3  ;;  %p1010_p7 = scmp.lt.s32.totalorder %s1004_s3, %s1004_s3 }
  0x32   :  { %p1011_p8 = por %p1010_p7, %p1009_p6 }
  0x34   :  { %p1012_p9 = pnand %p1011_p8, %p1005_p5 }
  0x36   :  { %1015 = shalt.err (!%p1012_p9)
}
  0x37   :  { %s1212_s28 = smov 128   ;;  %s1213_s12 = smov 8  }
  0x38   :  { %89 = dma.hbm_to_vmem [thread:$0]  %s1478_s5, 2048, %s84_s19, [#allocation12], %s1212_s28, %s1212_s28, %s1213_s12  }
  0x39   :  { %s1016_s1 = scalar_lea.hbm %s1480_s7, 1024 }
  0x3a   :  { %p1017_p10 = scmp.ne.s32.totalorder %s1480_s7, %s1016_s1  ;;  %p1020_p11 = scmp.lt.u32.totalorder %s1016_s1, %s1480_s7 }
  0x3c   :  { %p1022_p12 = pnand %p1020_p11, %p1017_p10 }
  0x3e   :  { %1025 = shalt.err (!%p1022_p12)
}
  0x3f   :  { %s1026_s25 = scalar_lea.vmem %s1310_s21, 1024  ;;  %p1031_p0 = scmp.lt.s32.totalorder %s1310_s21, %s1310_s21 }
  0x40   :  { %p1027_p13 = scmp.ne.s32.totalorder %s1310_s21, %s1026_s25  ;;  %p1032_p1 = scmp.lt.s32.totalorder %s1026_s25, %s1026_s25 }
  0x42   :  { %p1033_p2 = por %p1032_p1, %p1031_p0 }
  0x44   :  { %p1034_p3 = pnand %p1033_p2, %p1027_p13 }
  0x46   :  { %1037 = shalt.err (!%p1034_p3)
}
  0x47   :  { %111 = dma.hbm_to_vmem [thread:$0]  %s1480_s7, 1024, %s1310_s21, [#allocation15], %s1207_s23, %s1207_s23, %s1208_s24  }
  0x48   :  { %s1214_s26 = smov [#allocation2]   ;;  %s1215_s29 = smov [#allocation7]  }
  0x49   :  { %s27_s27 = sshll.u32 %s1214_s26, 4  ;;  %s52_s30 = sshll.u32 %s1215_s29, 4  ;;  %s28_s27 = int_to_ptr.vmem [resolvable:$true] %s27_s27  ;;  %s53_s30 = int_to_ptr.vmem [resolvable:$true] %s52_s30 }
  0x4a   :  { %s1038_s13 = scalar_lea.hbm %s1473_s0, 256 }
  0x4b   :  { %p1039_p4 = scmp.ne.s32.totalorder %s1473_s0, %s1038_s13  ;;  %p1042_p5 = scmp.lt.u32.totalorder %s1038_s13, %s1473_s0 }
  0x4d   :  { %p1044_p6 = pnand %p1042_p5, %p1039_p4 }
  0x4f   :  { %1047 = shalt.err (!%p1044_p6)
}
  0x50   :  { %s1048_s7 = scalar_lea.vmem %s28_s27, 256  ;;  %p1053_p8 = scmp.lt.s32.totalorder %s28_s27, %s28_s27 }
  0x51   :  { %p1049_p7 = scmp.ne.s32.totalorder %s28_s27, %s1048_s7  ;;  %p1054_p9 = scmp.lt.s32.totalorder %s1048_s7, %s1048_s7 }
  0x53   :  { %p1055_p10 = por %p1054_p9, %p1053_p8 }
  0x55   :  { %p1056_p11 = pnand %p1055_p10, %p1049_p7 }
  0x57   :  { %1059 = shalt.err (!%p1056_p11)
}
  0x58   :  { %33 = dma.hbm_to_vmem [thread:$0]  %s1473_s0, 256, %s28_s27, [#allocation3], %s1212_s28, %s1212_s28, %s1213_s12  }
  0x59   :  { %s1060_s20 = scalar_lea.hbm %s1475_s2, 16 }
  0x5a   :  { %p1061_p12 = scmp.ne.s32.totalorder %s1475_s2, %s1060_s20  ;;  %p1064_p13 = scmp.lt.u32.totalorder %s1060_s20, %s1475_s2 }
  0x5c   :  { %p1066_p0 = pnand %p1064_p13, %p1061_p12 }
  0x5e   :  { %1069 = shalt.err (!%p1066_p0)
}
  0x5f   :  { %s1070_s26 = scalar_lea.vmem %s53_s30, 16  ;;  %s1074_s29 = scalar_lea.vmem %s53_s30, 32 }
  0x60   :  { %p1071_p1 = scmp.ne.s32.totalorder %s53_s30, %s1070_s26  ;;  %p1075_p2 = scmp.lt.s32.totalorder %s53_s30, %s53_s30 }
  0x61   :  { %p1076_p3 = scmp.lt.s32.totalorder %s1074_s29, %s1070_s26 }
  0x63   :  { %p1077_p4 = por %p1076_p3, %p1075_p2 }
  0x65   :  { %p1078_p5 = pnand %p1077_p4, %p1071_p1 }
  0x67   :  { %1081 = shalt.err (!%p1078_p5)
}
  0x68   :  { %55 = dma.hbm_to_vmem [thread:$0]  %s1475_s2, 16, %s53_s30, [#allocation6]  }
  0x69   :  { %s1216_s11 = smov [#allocation10]   ;;  %s1217_s13 = smov [#allocation13]  }
  0x6a   :  { %s74_s3 = sshll.u32 %s1216_s11, 4  ;;  %s96_s15 = sshll.u32 %s1217_s13, 4  ;;  %s75_s3 = int_to_ptr.vmem [resolvable:$true] %s74_s3  ;;  %s97_s15 = int_to_ptr.vmem [resolvable:$true] %s96_s15 }
  0x6b   :  { %s1082_s1 = scalar_lea.hbm %s1477_s4, 16 }
  0x6c   :  { %p1083_p6 = scmp.ne.s32.totalorder %s1477_s4, %s1082_s1  ;;  %p1086_p7 = scmp.lt.u32.totalorder %s1082_s1, %s1477_s4 }
  0x6e   :  { %p1088_p8 = pnand %p1086_p7, %p1083_p6 }
  0x70   :  { %1091 = shalt.err (!%p1088_p8)
}
  0x71   :  { %s1092_s2 = scalar_lea.vmem %s75_s3, 16  ;;  %s1096_s30 = scalar_lea.vmem %s75_s3, 32 }
  0x72   :  { %p1093_p9 = scmp.ne.s32.totalorder %s75_s3, %s1092_s2  ;;  %p1097_p10 = scmp.lt.s32.totalorder %s75_s3, %s75_s3 }
  0x73   :  { %p1098_p11 = scmp.lt.s32.totalorder %s1096_s30, %s1092_s2 }
  0x75   :  { %p1099_p12 = por %p1098_p11, %p1097_p10 }
  0x77   :  { %p1100_p13 = pnand %p1099_p12, %p1093_p9 }
  0x79   :  { %1103 = shalt.err (!%p1100_p13)
}
  0x7a   :  { %77 = dma.hbm_to_vmem [thread:$0]  %s1477_s4, 16, %s75_s3, [#allocation9]  }
  0x7b   :  { %s1104_s5 = scalar_lea.hbm %s1479_s6, 16 }
  0x7c   :  { %p1105_p0 = scmp.ne.s32.totalorder %s1479_s6, %s1104_s5  ;;  %p1108_p1 = scmp.lt.u32.totalorder %s1104_s5, %s1479_s6 }
  0x7e   :  { %p1110_p2 = pnand %p1108_p1, %p1105_p0 }
  0x80   :  { %1113 = shalt.err (!%p1110_p2)
}
  0x81   :  { %s1114_s27 = scalar_lea.vmem %s97_s15, 16  ;;  %s1118_s11 = scalar_lea.vmem %s97_s15, 32 }
  0x82   :  { %p1115_p3 = scmp.ne.s32.totalorder %s97_s15, %s1114_s27  ;;  %p1119_p4 = scmp.lt.s32.totalorder %s97_s15, %s97_s15 }
  0x83   :  { %p1120_p5 = scmp.lt.s32.totalorder %s1118_s11, %s1114_s27 }
  0x85   :  { %p1121_p6 = por %p1120_p5, %p1119_p4 }
  0x87   :  { %p1122_p7 = pnand %p1121_p6, %p1115_p3 }
  0x89   :  { %1125 = shalt.err (!%p1122_p7)
}
  0x8a   :  { %99 = dma.hbm_to_vmem [thread:$0]  %s1479_s6, 16, %s97_s15, [#allocation12]  }
  0x8b   :  { %s1218_s13 = smov [#allocation16]   ;;  %s1219_s17 = smov [#allocation17]  }
  0x8c   :  { %s118_s16 = sshll.u32 %s1218_s13, 4  ;;  %s128_s1 = sshll.u32 %s1219_s17, 4  ;;  %s119_s16 = int_to_ptr.vmem [resolvable:$true] %s118_s16  ;;  %s129_s1 = int_to_ptr.vmem [resolvable:$true] %s128_s1 }
  0x8d   :  { %s1126_s21 = scalar_lea.hbm %s1481_s8, 16 }
  0x8e   :  { %p1127_p8 = scmp.ne.s32.totalorder %s1481_s8, %s1126_s21  ;;  %p1130_p9 = scmp.lt.u32.totalorder %s1126_s21, %s1481_s8 }
  0x90   :  { %p1132_p10 = pnand %p1130_p9, %p1127_p8 }
  0x92   :  { %1135 = shalt.err (!%p1132_p10)
}
  0x93   :  { %s1136_s6 = scalar_lea.vmem %s119_s16, 16  ;;  %s1140_s15 = scalar_lea.vmem %s119_s16, 32 }
  0x94   :  { %p1137_p11 = scmp.ne.s32.totalorder %s119_s16, %s1136_s6  ;;  %p1141_p12 = scmp.lt.s32.totalorder %s119_s16, %s119_s16 }
  0x95   :  { %p1142_p13 = scmp.lt.s32.totalorder %s1140_s15, %s1136_s6 }
  0x97   :  { %p1143_p0 = por %p1142_p13, %p1141_p12 }
  0x99   :  { %p1144_p1 = pnand %p1143_p0, %p1137_p11 }
  0x9b   :  { %1147 = shalt.err (!%p1144_p1)
}
  0x9c   :  { %121 = dma.hbm_to_vmem [thread:$0]  %s1481_s8, 16, %s119_s16, [#allocation15]  }
  0x9d   :  { %s1148_s19 = scalar_lea.hbm %s1482_s9, 16 }
  0x9e   :  { %p1149_p2 = scmp.ne.s32.totalorder %s1482_s9, %s1148_s19  ;;  %p1152_p3 = scmp.lt.u32.totalorder %s1148_s19, %s1482_s9 }
  0xa0   :  { %p1154_p4 = pnand %p1152_p3, %p1149_p2 }
  0xa2   :  { %1157 = shalt.err (!%p1154_p4)
}
  0xa3   :  { %s1158_s11 = scalar_lea.vmem %s129_s1, 16  ;;  %s1162_s4 = scalar_lea.vmem %s129_s1, 32 }
  0xa4   :  { %p1159_p5 = scmp.ne.s32.totalorder %s129_s1, %s1158_s11  ;;  %p1163_p6 = scmp.lt.s32.totalorder %s129_s1, %s129_s1 }
  0xa5   :  { %p1164_p7 = scmp.lt.s32.totalorder %s1162_s4, %s1158_s11 }
  0xa7   :  { %p1165_p8 = por %p1164_p7, %p1163_p6 }
  0xa9   :  { %p1166_p9 = pnand %p1165_p8, %p1159_p5 }
  0xab   :  { %1169 = shalt.err (!%p1166_p9)
}
  0xac   :  { %131 = dma.hbm_to_vmem [thread:$0]  %s1482_s9, 16, %s129_s1, [#allocation18]  }
  0xad   :  { %1192 = dma.done.wait [#allocation3], 256  }
  0xae   :  { %1193 = vsyncadd [#allocation3], 4294967040 }
  0xaf   :  { %1194 = dma.done.wait [#allocation6], 1040  }
  0xb0   :  { %1195 = vsyncadd [#allocation6], 4294966256 }
  0xb1   :  { %1196 = dma.done.wait [#allocation9], 1040  }
  0xb2   :  { %1197 = vsyncadd [#allocation9], 4294966256 }
  0xb3   :  { %1198 = dma.done.wait [#allocation12], 2064  }
  0xb4   :  { %1199 = vsyncadd [#allocation12], 4294965232 }
  0xb5   :  { %1200 = dma.done.wait [#allocation15], 1040  }
  0xb6   :  { %1201 = vsyncadd [#allocation15], 4294966256 }
  0xb7   :  { %1202 = dma.done.wait [#allocation18], 16  }
  0xb8   :  { %1203 = vsyncadd [#allocation18], 4294967280  ;;  %v1220_v0 = vmov 0.0   ;;  %vm1221_vm0 = vmmov 0   ;;  %v894_v1 = vld [vmem:[#allocation5] sm:$0xff]   ;;  %v895_v2 = vld [vmem:[#allocation5 + $0x8] sm:$0xff]  }
  0xb9   :  { %815 = vmatprep.subr.bf16.mxu0 %v1220_v0  ;;  %831 = vmatprep.mubr.msk.bf16.mxu0 %vm1221_vm0, %v1220_v0  ;;  %v896_v3 = vld [vmem:[#allocation5 + $0x10] sm:$0xff]   ;;  %v902_v4 = vld [vmem:[#allocation8] sm:$0xff]   ;;  %v897_v5 = vld [vmem:[#allocation5 + $0x18] sm:$0xff]   ;;  %v1222_v46 = vmov 0   ;;  %s1223_s9 = smov 80   ;;  %vm710_vm1 = vcmask 523264  }
  0xba   :  { %835 = vmatprep.subr.bf16.mxu1 %v1220_v0  ;;  %851 = vmatprep.mubr.msk.bf16.mxu1 %vm1221_vm0, %v1220_v0  ;;  %v903_v6 = vld [vmem:[#allocation8 + $0x8] sm:$0xff]   ;;  %v898_v7 = vld [vmem:[#allocation5 + $0x20] sm:$0xff]   ;;  %v904_v8 = vld [vmem:[#allocation8 + $0x10] sm:$0xff]   ;;  %vm713_vm2 = vcmask 654336   ;;  %vm716_vm3 = vcmask 687104  }
  0xbb   :  { %816 = vmatpush3.bf16.msra.mxu0 %v894_v1  ;;  %836 = vmatpush3.bf16.msra.mxu1 %v902_v4  ;;  %v899_v9 = vld [vmem:[#allocation5 + $0x28] sm:$0xff]   ;;  %v905_v10 = vld [vmem:[#allocation8 + $0x18] sm:$0xff]   ;;  %v900_v11 = vld [vmem:[#allocation5 + $0x30] sm:$0xff]  }
  0xbc   :  { %817 = vmatprep.subr.bf16.mxu0 %v1220_v0  ;;  %837 = vmatprep.subr.bf16.mxu1 %v1220_v0  ;;  %v906_v12 = vld [vmem:[#allocation8 + $0x20] sm:$0xff]   ;;  %v901_v13 = vld [vmem:[#allocation5 + $0x38] sm:$0xff]   ;;  %v163_v14 = vld [vmem:[#allocation2] sm:$0xff] }
  0xbd   :  { %v164_v15 = vld [vmem:[#allocation2 + $0x8] sm:$0xff]  ;;  %v907_v16 = vld [vmem:[#allocation8 + $0x28] sm:$0xff]   ;;  %v743_v34 = vld [vmem:[#allocation7] ss:$0 sm:$0xff] }
  0xbe   :  { %v165_v17 = vpack.c.bf16 %v164_v15, %v163_v14  ;;  %v908_v18 = vld [vmem:[#allocation8 + $0x30] sm:$0xff]   ;;  %v909_v19 = vld [vmem:[#allocation8 + $0x38] sm:$0xff]   ;;  %v910_v20 = vld [vmem:[#allocation11] ss:$8 sps:$4 sm:$0xff]  }
  0xbf   :  { %818 = vmatpush3.bf16.msra.mxu0 %v895_v2  ;;  %838 = vmatpush3.bf16.msra.mxu1 %v903_v6  ;;  %v912_v21 = vld [vmem:[#allocation11 + $0x4] ss:$8 sps:$4 sm:$0xff]   ;;  %v915_v22 = vld [vmem:[#allocation11 + $0x14] ss:$8 sps:$4 sm:$0xff]   ;;  %v913_v23 = vld [vmem:[#allocation11 + $0x10] ss:$8 sps:$4 sm:$0xff]  }
  0xc0   :  { %819 = vmatprep.subr.bf16.mxu0 %v1220_v0  ;;  %839 = vmatprep.subr.bf16.mxu1 %v1220_v0  ;;  %v918_v24 = vld [vmem:[#allocation11 + $0x24] ss:$8 sps:$4 sm:$0xff]   ;;  %v916_v25 = vld [vmem:[#allocation11 + $0x20] ss:$8 sps:$4 sm:$0xff]   ;;  %v921_v26 = vld [vmem:[#allocation11 + $0x34] ss:$8 sps:$4 sm:$0xff]  }
  0xc1   :  { %v919_v27 = vld [vmem:[#allocation11 + $0x30] ss:$8 sps:$4 sm:$0xff]   ;;  %v924_v28 = vld [vmem:[#allocation11 + $0x44] ss:$8 sps:$4 sm:$0xff]   ;;  %v922_v29 = vld [vmem:[#allocation11 + $0x40] ss:$8 sps:$4 sm:$0xff]  }
  0xc2   :  { %v927_v30 = vld [vmem:[#allocation11 + $0x54] ss:$8 sps:$4 sm:$0xff]   ;;  %v925_v31 = vld [vmem:[#allocation11 + $0x50] ss:$8 sps:$4 sm:$0xff]   ;;  %v930_v32 = vld [vmem:[#allocation11 + $0x64] ss:$8 sps:$4 sm:$0xff]  }
  0xc3   :  { %820 = vmatpush3.bf16.msra.mxu0 %v896_v3  ;;  %840 = vmatpush3.bf16.msra.mxu1 %v904_v8  ;;  %v928_v33 = vld [vmem:[#allocation11 + $0x60] ss:$8 sps:$4 sm:$0xff]   ;;  %v933_v44 = vld [vmem:[#allocation11 + $0x74] ss:$8 sps:$4 sm:$0xff]   ;;  %v931_v45 = vld [vmem:[#allocation11 + $0x70] ss:$8 sps:$4 sm:$0xff]  }
  0xc4   :  { %821 = vmatprep.subr.bf16.mxu0 %v1220_v0  ;;  %841 = vmatprep.subr.bf16.mxu1 %v1220_v0  ;;  %v752_v47 = vld [vmem:[#allocation10] ss:$0 sm:$0xff]  ;;  %v934_v59 = vld [vmem:[#allocation14] sm:$0xff]   ;;  %v935_v60 = vld [vmem:[#allocation14 + $0x8] sm:$0xff]  }
  0xc5   :  { %v936_v61 = vld [vmem:[#allocation14 + $0x10] sm:$0xff]   ;;  %v937_v62 = vld [vmem:[#allocation14 + $0x18] sm:$0xff]   ;;  %v938_v63 = vld [vmem:[#allocation14 + $0x20] sm:$0xff]  }
  0xc6   :  { %v939_v1 = vld [vmem:[#allocation14 + $0x28] sm:$0xff]   ;;  %v940_v2 = vld [vmem:[#allocation14 + $0x30] sm:$0xff]   ;;  %v941_v3 = vld [vmem:[#allocation14 + $0x38] sm:$0xff]  }
  0xc7   :  { %822 = vmatpush3.bf16.msra.mxu0 %v897_v5  ;;  %842 = vmatpush3.bf16.msra.mxu1 %v905_v10  ;;  %v777_v4 = vld [vmem:[#allocation13] ss:$0 sm:$0xff] }
  0xc8   :  { %823 = vmatprep.subr.bf16.mxu0 %v1220_v0  ;;  %843 = vmatprep.subr.bf16.mxu1 %v1220_v0 }
  0xcb   :  { %824 = vmatpush3.bf16.msra.mxu0 %v898_v7  ;;  %844 = vmatpush3.bf16.msra.mxu1 %v906_v12 }
  0xcc   :  { %825 = vmatprep.subr.bf16.mxu0 %v1220_v0  ;;  %845 = vmatprep.subr.bf16.mxu1 %v1220_v0 }
  0xcf   :  { %826 = vmatpush3.bf16.msra.mxu0 %v899_v9  ;;  %846 = vmatpush3.bf16.msra.mxu1 %v907_v16 }
  0xd0   :  { %827 = vmatprep.subr.bf16.mxu0 %v1220_v0  ;;  %847 = vmatprep.subr.bf16.mxu1 %v1220_v0 }
  0xd3   :  { %828 = vmatpush3.bf16.msra.mxu0 %v900_v11  ;;  %848 = vmatpush3.bf16.msra.mxu1 %v908_v18  ;;  %v787_v11 = vld [vmem:[#allocation17] ss:$0 sm:$0xff] }
  0xd4   :  { %829 = vmatprep.subr.bf16.mxu0 %v1220_v0  ;;  %849 = vmatprep.subr.bf16.mxu1 %v1220_v0 }
  0xd7   :  { %830 = vmatpush3.bf16.msra.mxu0 %v901_v13  ;;  %850 = vmatpush3.bf16.msra.mxu1 %v909_v19 }
  0xd8   :  { %855 = vmatprep.subr.bf16.mxu1 %v1220_v0  ;;  %490 = vmatprep.subr.bf16.mxu0 %v912_v21 }
  0xda   :  { %832 = vmatmul.mubr.bf16.vlgmr.msra.gmra.mrb[0].mxu0 %v165_v17 }
  0xdb   :  { %491 = vmatpush1.bf16.msra.mxu0 %v910_v20  ;;  %522 = vmatprep.mubr.bf16.mxu0 %v1222_v46 }
  0xdc   :  { %492 = vmatprep.subr.bf16.mxu0 %v915_v22 }
  0xdf   :  { %493 = vmatpush1.bf16.msra.mxu0 %v913_v23 }
  0xe0   :  { %494 = vmatprep.subr.bf16.mxu0 %v918_v24 }
  0xe3   :  { %495 = vmatpush1.bf16.msra.mxu0 %v916_v25 }
  0xe4   :  { %496 = vmatprep.subr.bf16.mxu0 %v921_v26 }
  0xe7   :  { %497 = vmatpush1.bf16.msra.mxu0 %v919_v27 }
  0xe8   :  { %498 = vmatprep.subr.bf16.mxu0 %v924_v28 }
  0xeb   :  { %499 = vmatpush1.bf16.msra.mxu0 %v922_v29 }
  0xec   :  { %500 = vmatprep.subr.bf16.mxu0 %v927_v30 }
  0xef   :  { %501 = vmatpush1.bf16.msra.mxu0 %v925_v31 }
  0xf0   :  { %502 = vmatprep.subr.bf16.mxu0 %v930_v32 }
  0xf3   :  { %503 = vmatpush1.bf16.msra.mxu0 %v928_v33 }
  0xf4   :  { %504 = vmatprep.subr.bf16.mxu0 %v933_v44 }
  0xf7   :  { %505 = vmatpush1.bf16.msra.mxu0 %v931_v45 }
 0x1ad   :  { %v271_v35 = vpop.f32.mrb[0].mxu0 }
 0x1ae   :  { %v272_v36 = vadd.f32 %v743_v34, %v271_v35  ;;  %v833_v37 = vpop.f32.mrb[1].mxu0 }
 0x1af   :  { %v274_v38 = vpop.f32.mrb[2].mxu0 }
 0x1b0   :  { %v275_v39 = vadd.f32 %v743_v34, %v274_v38  ;;  %v834_v40 = vpop.f32.mrb[3].mxu0  ;;  %v278_v41 = vmax.f32 %v272_v36, 0.0  ;;  %v778_v38 = vld [vmem:[#allocation16] ss:$0 sm:$0xff] }
 0x1b2   :  { %v279_v42 = vmax.f32 %v275_v39, 0.0 }
 0x1b4   :  { %v280_v43 = vpack.c.bf16 %v279_v42, %v278_v41 }
 0x1b6   :  { %852 = vmatmul.mubr.bf16.vlgmr.msra.gmra.mrb[0].mxu1 %v280_v43 }
 0x1b7   :  { %871 = vmatprep.mubr.msk.bf16.mxu1 %vm1221_vm0, %v1220_v0  ;;  %856 = vmatpush3.bf16.msra.mxu1 %v934_v59 }
 0x1b8   :  { %857 = vmatprep.subr.bf16.mxu1 %v1220_v0 }
 0x1bb   :  { %858 = vmatpush3.bf16.msra.mxu1 %v935_v60 }
 0x1bc   :  { %859 = vmatprep.subr.bf16.mxu1 %v1220_v0 }
 0x1bf   :  { %860 = vmatpush3.bf16.msra.mxu1 %v936_v61 }
 0x1c0   :  { %861 = vmatprep.subr.bf16.mxu1 %v1220_v0 }
 0x1c3   :  { %862 = vmatpush3.bf16.msra.mxu1 %v937_v62 }
 0x1c4   :  { %863 = vmatprep.subr.bf16.mxu1 %v1220_v0 }
 0x1c7   :  { %864 = vmatpush3.bf16.msra.mxu1 %v938_v63 }
 0x1c8   :  { %865 = vmatprep.subr.bf16.mxu1 %v1220_v0 }
 0x1cb   :  { %866 = vmatpush3.bf16.msra.mxu1 %v939_v1 }
 0x1cc   :  { %867 = vmatprep.subr.bf16.mxu1 %v1220_v0 }
 0x1cf   :  { %868 = vmatpush3.bf16.msra.mxu1 %v940_v2 }
 0x1d0   :  { %869 = vmatprep.subr.bf16.mxu1 %v1220_v0 }
 0x1d3   :  { %870 = vmatpush3.bf16.msra.mxu1 %v941_v3 }
 0x289   :  { %v386_v48 = vpop.f32.mrb[0].mxu1 }
 0x28a   :  { %v853_v49 = vpop.f32.mrb[1].mxu1  ;;  %v387_v51 = vadd.f32 %v752_v47, %v386_v48 }
 0x28b   :  { %v389_v50 = vpop.f32.mrb[2].mxu1 }
 0x28c   :  { %v1445_v52 = vadd.f32 %v752_v47, %v389_v50  ;;  %v854_v53 = vpop.f32.mrb[3].mxu1 }
 0x28e   :  { %v393_v54 = vpack.c.bf16 %v1445_v52, %v387_v51 }
 0x290   :  { %523 = vmatmul.mubr.bf16.vlgmr.msra.gmra.mrb[4].mxu0 %v393_v54  ;;  %v657_v55 = vunpack.c.l.bf16 %v393_v54  ;;  %v658_v57 = vunpack.c.h.bf16 %v393_v54 }
 0x292   :  { %v659_v56 = vmul.f32 %v657_v55, %v657_v55  ;;  %v660_v58 = vmul.f32 %v658_v57, %v658_v57 }
 0x294   :  { %661 = vadd.xlane.f32.xlu0 %v659_v56 }
 0x298   :  { %663 = vadd.xlane.f32.xlu0 %v660_v58 }
 0x2ae   :  { %696 = vrot.lane.b32.xlu0 %v387_v51, %s1207_s23 }
 0x321   :  { %v662_v5 = vpop.xlane.xlu0 %661 }
 0x325   :  { %v664_v16 = vpop.xlane.xlu0 %663 }
 0x329   :  { %v697_v41 = vpop.permute.xlu0 %696 }
 0x363   :  { %v524_v6 = vpop.f32.mrb[4].mxu0 }
 0x364   :  { %v540_v7 = vadd.f32 %v777_v4, %v524_v6  ;;  %v526_v8 = vpop.f32.mrb[5].mxu0 }
 0x365   :  { %v665_v9 = vmul.f32 2.0, %v526_v8  ;;  %v528_v10 = vpop.f32.mrb[6].mxu0 }
 0x366   :  { %v541_v12 = vadd.f32 %v777_v4, %v528_v10  ;;  %v530_v13 = vpop.f32.mrb[7].mxu0  ;;  %v542_v17 = vmax.f32 %v540_v7, 0.0 }
 0x367   :  { %v667_v14 = vsub.f32 %v662_v5, %v665_v9  ;;  %v666_v15 = vmul.f32 2.0, %v530_v13 }
 0x368   :  { %v543_v18 = vmax.f32 %v541_v12, 0.0 }
 0x369   :  { %v676_v19 = vadd.f32 %v787_v11, %v667_v14  ;;  %v668_v20 = vsub.f32 %v664_v16, %v666_v15 }
 0x36a   :  { %v544_v0 = vpack.c.bf16 %v543_v18, %v542_v17 }
 0x36b   :  { %v678_v21 = vmax.f32 %v676_v19, 0.0  ;;  %v677_v22 = vadd.f32 %v787_v11, %v668_v20 }
 0x36c   :  { %872 = vmatmul.mubr.bf16.vlgmr.msra.gmra.mrb[4].mxu1 %v544_v0 }
 0x36d   :  { %v680_v23 = vadd.f32 1.0, %v678_v21  ;;  %v679_v24 = vmax.f32 %v677_v22, 0.0 }
 0x36f   :  { %942 = vrcp.f32 %v680_v23  ;;  %v681_v25 = vadd.f32 1.0, %v679_v24 }
 0x371   :  { %944 = vrcp.f32 %v681_v25 }
 0x379   :  { %v943_v26 = vpop.eup %942 }
 0x37a   :  { %686 = vadd.xlane.f32.xlu1 %v943_v26 }
 0x37b   :  { %v945_v27 = vpop.eup %944 }
 0x37e   :  { %688 = vadd.xlane.f32.xlu1 %v945_v27 }
 0x38f   :  { %698 = vrot.lane.b32.xlu1 %v1445_v52, %s1207_s23  ;;  %s1224_s23 = smov [#allocation19]  }
 0x390   :  { %s726_s13 = sshll.u32 %s1224_s23, 4  ;;  %s727_s13 = int_to_ptr.vmem [resolvable:$true] %s726_s13 }
 0x391   :  { %s1170_s16 = scalar_lea.vmem %s727_s13, 256  ;;  %p1175_p11 = scmp.lt.s32.totalorder %s727_s13, %s727_s13 }
 0x392   :  { %p1171_p10 = scmp.ne.s32.totalorder %s727_s13, %s1170_s16  ;;  %p1176_p12 = scmp.lt.s32.totalorder %s1170_s16, %s1170_s16 }
 0x394   :  { %p1177_p13 = por %p1176_p12, %p1175_p11 }
 0x396   :  { %p1178_p0 = pnand %p1177_p13, %p1171_p10 }
 0x407   :  { %v687_v28 = vpop.xlane.xlu1 %686 }
 0x408   :  { %946 = vrcp.f32 %v687_v28 }
 0x40b   :  { %v689_v29 = vpop.xlane.xlu1 %688 }
 0x40c   :  { %948 = vrcp.f32 %v689_v29 }
 0x40f   :  { %v699_v39 = vpop.permute.xlu1 %698 }
 0x412   :  { %v947_v30 = vpop.eup %946 }
 0x413   :  { %v691_v31 = vmul.f32 %v947_v30, %v943_v26 }
 0x415   :  { %704 = vrot.lane.b32.xlu1 %v691_v31, %s1223_s9 }
 0x416   :  { %v949_v32 = vpop.eup %948 }
 0x417   :  { %v693_v33 = vmul.f32 %v949_v32, %v945_v27 }
 0x419   :  { %706 = vrot.lane.b32.xlu1 %v693_v33, %s1223_s9 }
 0x43f   :  { %v650_v34 = vpop.f32.mrb[4].mxu1 }
 0x440   :  { %v873_v35 = vpop.f32.mrb[5].mxu1  ;;  %v651_v40 = vadd.f32 %v778_v38, %v650_v34 }
 0x441   :  { %v653_v36 = vpop.f32.mrb[6].mxu1 }
 0x442   :  { %v874_v37 = vpop.f32.mrb[7].mxu1  ;;  %v654_v42 = vadd.f32 %v778_v38, %v653_v36  ;;  %v711_v43 = vsel %vm710_vm1, %v651_v40, %v697_v41 }
 0x444   :  { %v712_v47 = vsel %vm710_vm1, %v654_v42, %v699_v39 }
 0x487   :  { %v705_v44 = vpop.permute.xlu1 %704 }
 0x488   :  { %v714_v45 = vsel %vm713_vm2, %v711_v43, %v705_v44 }
 0x489   :  { %v717_v46 = vsel %vm716_vm3, %v714_v45, 0.0 }
 0x48a   :  { %719 = vst [vmem:[#allocation19] sm:$0xff] %v717_v46 }
 0x48b   :  { %v707_v48 = vpop.permute.xlu1 %706 }
 0x48c   :  { %v715_v49 = vsel %vm713_vm2, %v712_v47, %v707_v48 }
 0x48d   :  { %v718_v50 = vsel %vm716_vm3, %v715_v49, 0.0 }
 0x48e   :  { %720 = vst [vmem:[#allocation19 + $0x8] sm:$0xff] %v718_v50 }
 0x48f   :  { %1181 = shalt.err (!%p1178_p0)
}
 0x490   :  { %s1182_s7 = scalar_lea.hbm %s1483_s10, 256 }
 0x491   :  { %p1183_p1 = scmp.ne.s32.totalorder %s1483_s10, %s1182_s7  ;;  %p1186_p2 = scmp.lt.u32.totalorder %s1182_s7, %s1483_s10 }
 0x493   :  { %p1188_p3 = pnand %p1186_p2, %p1183_p1 }
 0x495   :  { %1191 = shalt.err (!%p1188_p3)
}
 0x496   :  { %732 = dma.vmem_to_hbm [thread:$0]  %s727_s13, 256, %s1483_s10, [#allocation4], %s1212_s28, %s1212_s28, %s1213_s12  }
 0x497   :  { %1204 = dma.done.wait [#allocation4], 256  }
 0x498   :  { %1205 = vsyncadd [#allocation4], 4294967040 }
 0x499   :  { %736 = vsyncpa [#allocation3], 1 }
 0x49a   :  { %737 = vsyncpa [#allocation6], 1 }
 0x49b   :  { %738 = vsyncpa [#allocation9], 1 }
 0x49c   :  { %739 = vsyncpa [#allocation12], 1 }
 0x49d   :  { %740 = vsyncpa [#allocation15], 1 }
 0x49e   :  { %741 = vsyncpa [#allocation18], 1 }
 0x49f   :  { %742 = vsyncpa [#allocation4], 1 }

</bundles_post_ra>
